<compile_context>
chip_gen: v6e
topology: v6e:2x2x1
jax: 0.10.0
libtpu: 0.0.40
codegen_flags: <defaults>
</compile_context>

<pallas_src>
import functools

import jax
import jax.numpy as jnp
from jax.experimental import pallas as pl
from jax.experimental.pallas import tpu as pltpu


def _tafl_kernel(prob_ref, tgt_ref, out_ref, *, gamma, loss_weight):
    x = prob_ref[...]
    t = tgt_ref[...]
    # Numerically stable BCE-with-logits: max(x,0) - x*t + log1p(exp(-|x|))
    ce = jnp.maximum(x, 0.0) - x * t + jnp.log1p(jnp.exp(-jnp.abs(x)))
    d = jnp.abs(t - x)  # raw logits in the modulating term (matches the PyTorch code)
    g = float(gamma)
    if g >= 0.0 and g == float(int(g)):
        # Integer gamma: unroll into plain VPU multiplies (no EUP exp/log).
        n = int(g)
        if n == 0:
            mod = jnp.ones_like(d)
        else:
            mod = d
            for _ in range(n - 1):
                mod = mod * d
    else:
        mod = jnp.power(d, g)
    out_ref[...] = (loss_weight * mod * ce).astype(out_ref.dtype)


_TARGET_TILE_BYTES = 1 << 20  # ~1 MiB f32 per operand per grid step


def _choose_layout(total):
    """Pick (lanes, rows, block_rows, pad_elems) for a lane-dense 2D slab."""
    lanes = None
    for cand in (512, 256, 128):
        if total % cand == 0:
            lanes = cand
            break
    pad = 0
    if lanes is None:
        # Fallback only for sizes not divisible by 128: pad flat length to 128 lanes.
        lanes = 128
        padded = ((total + lanes - 1) // lanes) * lanes
        pad = padded - total
    rows = (total + pad) // lanes
    target_rows = max(8, _TARGET_TILE_BYTES // (4 * lanes))
    if rows <= target_rows:
        block_rows = rows  # single full-extent block (always legal)
    else:
        block_rows = max(8, target_rows - (target_rows % 8))  # (8,128)-aligned tile
    return lanes, rows, block_rows, pad


def task_aligned_focal_loss_pallas(prob, target, alignment_metric=None,
                                   gamma=2.0, loss_weight=1.0):
    """Elementwise task-aligned focal loss. Inputs NCHW float32, output NCHW float32.

    `alignment_metric` is accepted for API parity but unused (it lands in the unused
    `weight` argument of the reference `task_aigned_focal_loss`).
    """
    del alignment_metric  # unused in the reference forward path
    orig_shape = prob.shape
    total = 1
    for d in orig_shape:
        total *= int(d)

    lanes, rows, block_rows, pad = _choose_layout(total)

    def _to_slab(x):
        xf = x.astype(jnp.float32).reshape(-1)
        if pad:
            xf = jnp.pad(xf, (0, pad))
        return xf.reshape(rows, lanes)

    prob2d = _to_slab(prob)
    tgt2d = _to_slab(target)

    grid_steps = (rows + block_rows - 1) // block_rows
    kernel = functools.partial(_tafl_kernel, gamma=gamma, loss_weight=loss_weight)

    out2d = pl.pallas_call(
        kernel,
        out_shape=jax.ShapeDtypeStruct((rows, lanes), jnp.float32),
        grid_spec=pltpu.PrefetchScalarGridSpec(
            num_scalar_prefetch=0,
            grid=(grid_steps,),
            in_specs=[
                pl.BlockSpec((block_rows, lanes), lambda i: (i, 0)),
                pl.BlockSpec((block_rows, lanes), lambda i: (i, 0)),
            ],
            out_specs=pl.BlockSpec((block_rows, lanes), lambda i: (i, 0)),
        ),
        compiler_params=pltpu.CompilerParams(
            dimension_semantics=("parallel",)),
    )(prob2d, tgt2d)

    if pad:
        out = out2d.reshape(-1)[:total].reshape(orig_shape)
    else:
        out = out2d.reshape(orig_shape)
    return out


def _reference(prob, target, gamma=2.0, loss_weight=1.0):
    # Pure-JAX reference matching F.binary_cross_entropy_with_logits + modulation.
    ce = jnp.maximum(prob, 0.0) - prob * target + jnp.log1p(jnp.exp(-jnp.abs(prob)))
    return loss_weight * jnp.power(jnp.abs(target - prob), gamma) * ce


if __name__ == "__main__":
    key = jax.random.PRNGKey(0)
    k1, k2, k3 = jax.random.split(key, 3)

    N, C, H, W = 2, 4, 16, 16          # NCHW, matches the PyTorch convention
    prob = jax.random.normal(k1, (N, C, H, W), dtype=jnp.float32)               # logits
    target = jax.random.uniform(k2, (N, C, H, W), dtype=jnp.float32)            # soft labels in [0,1]
    alignment_metric = jax.random.uniform(k3, (N, C, H, W), dtype=jnp.float32)  # unused downstream

    loss = task_aligned_focal_loss_pallas(prob, target, alignment_metric,
                                          gamma=2.0, loss_weight=1.0)
    loss = jax.block_until_ready(loss)

    ref = _reference(prob, target, gamma=2.0, loss_weight=1.0)
    assert loss.shape == (N, C, H, W)
    assert jnp.allclose(loss, ref, atol=1e-5, rtol=1e-5)

    print("KERNEL_OK")
</pallas_src>

<mosaic_0001>
module attributes {stable_mosaic.version = 11 : i64} {
  func.func @_tafl_kernel(%arg0: i32, %arg1: memref<4x512xf32, #tpu.memory_space<vmem>>, %arg2: memref<4x512xf32, #tpu.memory_space<vmem>>, %arg3: memref<4x512xf32, #tpu.memory_space<vmem>>) attributes {dimension_semantics = [#tpu.dimension_semantics<parallel>], iteration_bounds = array<i64: 1>, scalar_prefetch = 0 : i64, scratch_operands = 0 : i64, tpu.core_type = #tpu.core_type<tc>, window_params = [{transform_indices = @transform_0, window_bounds = array<i64: 4, 512>}, {transform_indices = @transform_1, window_bounds = array<i64: 4, 512>}, {transform_indices = @transform_2, window_bounds = array<i64: 4, 512>}]} {
    %c0 = arith.constant 0 : index
    %c0_0 = arith.constant 0 : index
    %0 = vector.load %arg1[%c0, %c0_0] : memref<4x512xf32, #tpu.memory_space<vmem>>, vector<4x512xf32>
    %c0_1 = arith.constant 0 : index
    %c0_2 = arith.constant 0 : index
    %1 = vector.load %arg2[%c0_1, %c0_2] : memref<4x512xf32, #tpu.memory_space<vmem>>, vector<4x512xf32>
    %cst = arith.constant 0.000000e+00 : f32
    %2 = vector.broadcast %cst : f32 to vector<4x512xf32>
    %3 = arith.maximumf %0, %2 : vector<4x512xf32>
    %4 = arith.mulf %0, %1 : vector<4x512xf32>
    %5 = arith.subf %3, %4 : vector<4x512xf32>
    %6 = math.absf %0 : vector<4x512xf32>
    %cst_3 = arith.constant 0.000000e+00 : f32
    %7 = vector.broadcast %cst_3 : f32 to vector<4x512xf32>
    %8 = arith.subf %7, %6 : vector<4x512xf32>
    %9 = math.exp %8 : vector<4x512xf32>
    %10 = math.log1p %9 : vector<4x512xf32>
    %11 = arith.addf %5, %10 : vector<4x512xf32>
    %12 = arith.subf %1, %0 : vector<4x512xf32>
    %13 = math.absf %12 : vector<4x512xf32>
    %14 = arith.mulf %13, %13 : vector<4x512xf32>
    %cst_4 = arith.constant 1.000000e+00 : f32
    %15 = vector.broadcast %cst_4 : f32 to vector<4x512xf32>
    %16 = arith.mulf %15, %14 : vector<4x512xf32>
    %17 = arith.mulf %16, %11 : vector<4x512xf32>
    %c0_5 = arith.constant 0 : index
    %c0_6 = arith.constant 0 : index
    %18 = vector.load %arg3[%c0_5, %c0_6] : memref<4x512xf32, #tpu.memory_space<vmem>>, vector<4x512xf32>
    tpu.vector_store %arg3[%c0_5, %c0_6], %17 {strides = array<i32>} : memref<4x512xf32, #tpu.memory_space<vmem>>, vector<4x512xf32>,
    return
  }
  func.func @transform_0(%arg0: i32) -> (i32, i32) {
    %c0_i32 = arith.constant 0 : i32
    %c0_i32_0 = arith.constant 0 : i32
    return %arg0, %c0_i32 : i32, i32
  }
  func.func @transform_1(%arg0: i32) -> (i32, i32) {
    %c0_i32 = arith.constant 0 : i32
    %c0_i32_0 = arith.constant 0 : i32
    return %arg0, %c0_i32 : i32, i32
  }
  func.func @transform_2(%arg0: i32) -> (i32, i32) {
    %c0_i32 = arith.constant 0 : i32
    %c0_i32_0 = arith.constant 0 : i32
    return %arg0, %c0_i32 : i32, i32
  }
}

</mosaic_0001>

<bundles_post_ra>
// kernel: tpu_custom_call.1
= control target key start
LH: loop header
LB: loop body
LE: loop exit
PB: predicated region body
PF: predicated region fallthrough
CT: control target
= control target key end

     0   :  { %7 = vsyncpa [#allocation3], 0  ;;  %s204_s0 = inlined_call_operand.hbm [shape: f32[4,512], index: 0, kind: input, shape index: {}]   ;;  %s205_s1 = inlined_call_operand.hbm [shape: f32[4,512], index: 1, kind: input, shape index: {}]   ;;  %s206_s2 = inlined_call_operand.hbm [shape: f32[4,512], index: 2, kind: output, shape index: {}]  }
   0x1   :  { %8 = vsyncpa [#allocation6], 0 }
   0x2   :  { %9 = vsyncpa [#allocation4], 0  ;;  %s177_s9 = smov [#allocation2]   ;;  %s178_s11 = smov [#allocation5]  }
   0x3   :  { %s16_s10 = sshll.u32 %s177_s9, 4  ;;  %s26_s12 = sshll.u32 %s178_s11, 4  ;;  %s17_s10 = int_to_ptr.vmem [resolvable:$true] %s16_s10  ;;  %s27_s12 = int_to_ptr.vmem [resolvable:$true] %s26_s12 }
   0x4   :  { %s119_s13 = scalar_lea.vmem %s17_s10, 256  ;;  %p124_p1 = scmp.lt.s32.totalorder %s17_s10, %s17_s10 }
   0x5   :  { %p120_p0 = scmp.ne.s32.totalorder %s17_s10, %s119_s13  ;;  %p125_p2 = scmp.lt.s32.totalorder %s119_s13, %s119_s13 }
   0x7   :  { %p126_p3 = por %p125_p2, %p124_p1 }
   0x9   :  { %p127_p4 = pnand %p126_p3, %p120_p0 }
   0xb   :  { %130 = shalt.err (!%p127_p4)
}
   0xc   :  { %19 = dma.hbm_to_vmem [thread:$0]  %s204_s0, 256, %s17_s10, [#allocation3]  }
   0xd   :  { %s139_s16 = scalar_lea.vmem %s27_s12, 256  ;;  %p144_p6 = scmp.lt.s32.totalorder %s27_s12, %s27_s12 }
   0xe   :  { %p140_p5 = scmp.ne.s32.totalorder %s27_s12, %s139_s16  ;;  %p145_p7 = scmp.lt.s32.totalorder %s139_s16, %s139_s16 }
  0x10   :  { %p146_p8 = por %p145_p7, %p144_p6 }
  0x12   :  { %p147_p9 = pnand %p146_p8, %p140_p5 }
  0x14   :  { %150 = shalt.err (!%p147_p9)
}
  0x15   :  { %29 = dma.hbm_to_vmem [thread:$0]  %s205_s1, 256, %s27_s12, [#allocation6]  }
  0x16   :  { %171 = dma.done.wait [#allocation3], 256  }
  0x17   :  { %172 = vsyncadd [#allocation3], 4294967040 }
  0x18   :  { %173 = dma.done.wait [#allocation6], 256  }
  0x19   :  { %174 = vsyncadd [#allocation6], 4294967040  ;;  %v36_v0 = vld [vmem:[#allocation2] sm:$0xff]  ;;  %v37_v1 = vld [vmem:[#allocation2 + $0x8] sm:$0xff]  ;;  %s179_s0 = smov [#allocation7]  }
  0x1a   :  { %v46_v2 = vand.u32 2147483647, %v36_v0  ;;  %v47_v3 = vand.u32 2147483647, %v37_v1  ;;  %v38_v12 = vld [vmem:[#allocation5] sm:$0xff]  ;;  %v39_v14 = vld [vmem:[#allocation5 + $0x8] sm:$0xff] }
  0x1b   :  { %v74_v16 = vsub.f32 %v38_v12, %v36_v0  ;;  %v75_v18 = vsub.f32 %v39_v14, %v37_v1  ;;  %v40_v19 = vmax.f32 %v36_v0, 0.0  ;;  %v42_v20 = vmul.f32 %v38_v12, %v36_v0  ;;  %s90_s1 = sshll.u32 %s179_s0, 4  ;;  %s91_s1 = int_to_ptr.vmem [resolvable:$true] %s90_s1 }
  0x1c   :  { %v48_v4 = vsub.f32 0.0, %v46_v2  ;;  %v49_v5 = vsub.f32 0.0, %v47_v3  ;;  %v41_v23 = vmax.f32 %v37_v1, 0.0  ;;  %v43_v24 = vmul.f32 %v39_v14, %v37_v1  ;;  %s151_s19 = scalar_lea.vmem %s91_s1, 256  ;;  %p156_p11 = scmp.lt.s32.totalorder %s91_s1, %s91_s1 }
  0x1d   :  { %v76_v26 = vand.u32 2147483647, %v74_v16  ;;  %v77_v28 = vand.u32 2147483647, %v75_v18  ;;  %v44_v30 = vsub.f32 %v40_v19, %v42_v20  ;;  %p152_p10 = scmp.ne.s32.totalorder %s91_s1, %s151_s19  ;;  %p157_p12 = scmp.lt.s32.totalorder %s151_s19, %s151_s19 }
  0x1e   :  { %v50_v6 = vmul.f32 1.442695, %v48_v4  ;;  %v52_v7 = vmul.f32 1.442695, %v49_v5  ;;  %v45_v34 = vsub.f32 %v41_v23, %v43_v24 }
  0x1f   :  { %v78_v35 = vmul.f32 %v76_v26, %v76_v26  ;;  %v79_v38 = vmul.f32 %v77_v28, %v77_v28  ;;  %p158_p13 = por %p157_p12, %p156_p11 }
  0x20   :  { %103 = vpow2.f32 %v50_v6 }
  0x21   :  { %105 = vpow2.f32 %v52_v7  ;;  %p159_p0 = pnand %p158_p13, %p152_p10 }
  0x2d   :  { %v104_v8 = vpop.eup %103 }
  0x2e   :  { %v106_v9 = vpop.eup %105  ;;  %v54_v10 = vadd.f32 1.0, %v104_v8  ;;  %v57_v13 = vmul.f32 -0.5, %v104_v8  ;;  %v60_v21 = vand.u32 2147483647, %v104_v8 }
  0x2f   :  { %v63_v11 = vadd.f32 1.0, %v106_v9  ;;  %v66_v15 = vmul.f32 -0.5, %v106_v9  ;;  %v69_v25 = vand.u32 2147483647, %v106_v9 }
  0x30   :  { %107 = vlog2.f32 %v54_v10  ;;  %v58_v17 = vadd.f32 1.0, %v57_v13  ;;  %vm61_vm0 = vcmp.lt.f32.partialorder %v60_v21, 0.0004427343 }
  0x31   :  { %109 = vlog2.f32 %v63_v11  ;;  %v67_v22 = vadd.f32 1.0, %v66_v15  ;;  %vm70_vm1 = vcmp.lt.f32.partialorder %v69_v25, 0.0004427343 }
  0x32   :  { %v59_v27 = vmul.f32 %v104_v8, %v58_v17 }
  0x33   :  { %v68_v31 = vmul.f32 %v106_v9, %v67_v22 }
  0x3d   :  { %v108_v29 = vpop.eup %107 }
  0x3e   :  { %v110_v32 = vpop.eup %109  ;;  %v56_v33 = vmul.f32 0.6931472, %v108_v29 }
  0x3f   :  { %v65_v36 = vmul.f32 0.6931472, %v110_v32 }
  0x40   :  { %v62_v37 = vsel %vm61_vm0, %v59_v27, %v56_v33 }
  0x41   :  { %v72_v39 = vadd.f32 %v62_v37, %v44_v30  ;;  %v71_v40 = vsel %vm70_vm1, %v68_v31, %v65_v36 }
  0x42   :  { %v73_v41 = vadd.f32 %v71_v40, %v45_v34 }
  0x43   :  { %v80_v42 = vmul.f32 %v78_v35, %v72_v39 }
  0x44   :  { %v81_v43 = vmul.f32 %v79_v38, %v73_v41 }
  0x45   :  { %82 = vst [vmem:[#allocation7] sm:$0xff] %v80_v42 }
  0x46   :  { %83 = vst [vmem:[#allocation7 + $0x8] sm:$0xff] %v81_v43 }
  0x47   :  { %162 = shalt.err (!%p159_p0)
}
  0x48   :  { %93 = dma.vmem_to_hbm [thread:$0]  %s91_s1, 256, %s206_s2, [#allocation4]  }
  0x49   :  { %175 = dma.done.wait [#allocation4], 256  }
  0x4a   :  { %176 = vsyncadd [#allocation4], 4294967040 }
  0x4b   :  { %97 = vsyncpa [#allocation3], 1 }
  0x4c   :  { %98 = vsyncpa [#allocation6], 1 }
  0x4d   :  { %99 = vsyncpa [#allocation4], 1 }

</bundles_post_ra>
